<compile_context>
chip_gen: v7x
topology: tpu7x:2x2x1
jax: 0.10.0
libtpu: 0.0.40
codegen_flags: <defaults>
</compile_context>

<pallas_src>
import functools

import jax
import jax.numpy as jnp
from jax.experimental import pallas as pl
from jax.experimental.pallas import tpu as pltpu


def _round_up(n, m):
    return ((n + m - 1) // m) * m


def _head_kernel(x_ref, w1_ref, b1_ref, w2_ref, b2_ref, o_ref):
    # x_ref:  (tb, Hp)   batch tile of features
    # w1_ref: (Hp, Hp)   dense.weight, PyTorch [out, in] layout (padded)
    # b1_ref: (1, Hp)    dense.bias (padded)
    # w2_ref: (Lp, Hp)   out_proj.weight, PyTorch [out, in] layout (padded)
    # b2_ref: (1, Lp)    out_proj.bias (padded)
    # o_ref:  (tb, Lp)   logits tile (lane-dense, Lp = multiple of 128)
    x = x_ref[...]                                   # keep native dtype for MXU

    # x = dropout(x) -> identity (eval mode)
    # h = tanh(dense(x)) ; contract axis 1 of both -> x @ W1.T, f32 accumulate
    h = jax.lax.dot_general(
        x, w1_ref[...],
        dimension_numbers=(((1,), (1,)), ((), ())),
        preferred_element_type=jnp.float32)
    h = jnp.tanh(h + b1_ref[...].astype(jnp.float32))
    h = h.astype(w2_ref.dtype)                       # back to operand dtype

    # h = dropout(h) -> identity (eval mode)
    # out = out_proj(h) = h @ W2.T + b2, f32 accumulate
    out = jax.lax.dot_general(
        h, w2_ref[...],
        dimension_numbers=(((1,), (1,)), ((), ())),
        preferred_element_type=jnp.float32)
    out = out + b2_ref[...].astype(jnp.float32)
    o_ref[...] = out.astype(o_ref.dtype)


@functools.partial(jax.jit, static_argnames=("block_b",))
def classification_head(x, w_dense, b_dense, w_out, b_out, *, block_b=256):
    """Pallas forward pass of ClassificationHead (eval mode).

    Args:
      x:       [B, H]   input features
      w_dense: [H, H]   dense.weight in PyTorch layout [out, in]
      b_dense: [H]      dense.bias
      w_out:   [L, H]   out_proj.weight in PyTorch layout [out, in]
      b_out:   [L]      out_proj.bias
    Returns:
      [B, L] logits
    """
    B, H = x.shape
    L = w_out.shape[0]

    # --- wrapper glue: lane-dense padding (no weight transpose needed) -------
    Hp = _round_up(H, 128)
    Lp = _round_up(L, 128)
    Bp = _round_up(B, 8)

    xp = x if (Bp, Hp) == (B, H) else jnp.pad(x, ((0, Bp - B), (0, Hp - H)))
    w1 = w_dense if Hp == H else jnp.pad(w_dense, ((0, Hp - H), (0, Hp - H)))
    b1 = b_dense.reshape(1, H)
    if Hp != H:
        b1 = jnp.pad(b1, ((0, 0), (0, Hp - H)))
    w2 = w_out if (Lp, Hp) == (L, H) else jnp.pad(
        w_out, ((0, Lp - L), (0, Hp - H)))
    b2 = b_out.reshape(1, L)
    if Lp != L:
        b2 = jnp.pad(b2, ((0, 0), (0, Lp - L)))

    # --- batch tile selection -------------------------------------------------
    itx = jnp.dtype(x.dtype).itemsize
    itw = jnp.dtype(w_dense.dtype).itemsize
    # Weight/bias blocks are resident (constant index_map); count 2x for the
    # pipeliner's buffering.
    weight_bytes = 2 * itw * (Hp * Hp + Lp * Hp + Hp + Lp)

    def tile_bytes(t):
        return 2 * itx * t * (Hp + Lp)      # x tile + out tile, double-buffered

    vmem_budget = 40 * 1024 * 1024          # conservative across v5e/v6e/v7x

    tb = _round_up(min(block_b, Bp), 8)
    while tb > 8 and weight_bytes + tile_bytes(tb) > vmem_budget:
        tb = _round_up(tb // 2, 8)

    # Prefer >= 2 grid steps so the parallel batch axis can shard across both
    # v7x TensorCores (no-op for the tiny test shape, which collapses to (1,)).
    if pl.cdiv(Bp, tb) < 2 and Bp >= 16:
        tb = _round_up(pl.cdiv(Bp, 2), 8)

    grid = (pl.cdiv(Bp, tb),)

    out_padded = pl.pallas_call(
        _head_kernel,
        out_shape=jax.ShapeDtypeStruct((Bp, Lp), x.dtype),
        grid_spec=pltpu.PrefetchScalarGridSpec(
            num_scalar_prefetch=0,
            grid=grid,
            in_specs=[
                pl.BlockSpec((tb, Hp), lambda i: (i, 0)),   # x batch tile
                pl.BlockSpec((Hp, Hp), lambda i: (0, 0)),   # dense.weight (resident)
                pl.BlockSpec((1, Hp), lambda i: (0, 0)),    # dense.bias
                pl.BlockSpec((Lp, Hp), lambda i: (0, 0)),   # out_proj.weight (resident)
                pl.BlockSpec((1, Lp), lambda i: (0, 0)),    # out_proj.bias
            ],
            out_specs=pl.BlockSpec((tb, Lp), lambda i: (i, 0)),
        ),
        compiler_params=pltpu.CompilerParams(
            dimension_semantics=("parallel",),
            vmem_limit_bytes=64 * 1024 * 1024,
        ),
    )(xp, w1, b1, w2, b2)

    return out_padded[:B, :L]


def _reference(x, w_dense, b_dense, w_out, b_out):
    hi = jax.lax.Precision.HIGHEST
    h = jnp.tanh(jnp.dot(x, w_dense.T, precision=hi) + b_dense)
    return jnp.dot(h, w_out.T, precision=hi) + b_out


if __name__ == "__main__":
    # Small, module-consistent shapes: batch=8, hidden_size=32, num_labels=2.
    B, H, L = 8, 32, 2

    key = jax.random.PRNGKey(0)
    kx, kw1, kb1, kw2, kb2 = jax.random.split(key, 5)

    x = jax.random.normal(kx, (B, H), dtype=jnp.float32)
    # Deterministic synthetic parameters (no checkpoint load).
    w_dense = jax.random.normal(kw1, (H, H), dtype=jnp.float32) * 0.05
    b_dense = jax.random.normal(kb1, (H,), dtype=jnp.float32) * 0.05
    w_out = jax.random.normal(kw2, (L, H), dtype=jnp.float32) * 0.05
    b_out = jax.random.normal(kb2, (L,), dtype=jnp.float32) * 0.05

    out = classification_head(x, w_dense, b_dense, w_out, b_out)
    out = jax.block_until_ready(out)

    ref = _reference(x, w_dense, b_dense, w_out, b_out)
    assert out.shape == (B, L), out.shape
    err = float(jnp.max(jnp.abs(out - ref)))
    assert err < 1e-4, err

    print("KERNEL_OK")
</pallas_src>

<mosaic_0001>
module attributes {stable_mosaic.version = 11 : i64} {
  func.func @_head_kernel(%arg0: i32, %arg1: memref<8x128xf32, #tpu.memory_space<vmem>>, %arg2: memref<128x128xf32, #tpu.memory_space<vmem>>, %arg3: memref<1x128xf32, #tpu.memory_space<vmem>>, %arg4: memref<128x128xf32, #tpu.memory_space<vmem>>, %arg5: memref<1x128xf32, #tpu.memory_space<vmem>>, %arg6: memref<8x128xf32, #tpu.memory_space<vmem>>) attributes {dimension_semantics = [#tpu.dimension_semantics<parallel>], iteration_bounds = array<i64: 1>, scalar_prefetch = 0 : i64, scratch_operands = 0 : i64, tpu.core_type = #tpu.core_type<tc>, window_params = [{transform_indices = @transform_0, window_bounds = array<i64: 8, 128>}, {pipeline_mode = #tpu.pipeline_mode<synchronous>, transform_indices = @transform_1, window_bounds = array<i64: 128, 128>}, {pipeline_mode = #tpu.pipeline_mode<synchronous>, transform_indices = @transform_2, window_bounds = array<i64: 1, 128>}, {pipeline_mode = #tpu.pipeline_mode<synchronous>, transform_indices = @transform_3, window_bounds = array<i64: 128, 128>}, {pipeline_mode = #tpu.pipeline_mode<synchronous>, transform_indices = @transform_4, window_bounds = array<i64: 1, 128>}, {transform_indices = @transform_5, window_bounds = array<i64: 8, 128>}]} {
    %c0 = arith.constant 0 : index
    %c0_0 = arith.constant 0 : index
    %0 = vector.load %arg1[%c0, %c0_0] : memref<8x128xf32, #tpu.memory_space<vmem>>, vector<8x128xf32>
    %c0_1 = arith.constant 0 : index
    %c0_2 = arith.constant 0 : index
    %1 = vector.load %arg2[%c0_1, %c0_2] : memref<128x128xf32, #tpu.memory_space<vmem>>, vector<128x128xf32>
    %cst = arith.constant dense<0.000000e+00> : vector<8x128xf32>
    %2 = tpu.matmul %0, %1, %cst {dimension_numbers = #tpu.dot_dimension_numbers<[1], [1], [0], [0], [0, 0, 1, 0], [], []>} : vector<8x128xf32>, vector<128x128xf32>, vector<8x128xf32> -> vector<8x128xf32>
    %c0_3 = arith.constant 0 : index
    %c0_4 = arith.constant 0 : index
    %3 = vector.load %arg3[%c0_3, %c0_4] : memref<1x128xf32, #tpu.memory_space<vmem>>, vector<1x128xf32>
    %4 = vector.broadcast %3 : vector<1x128xf32> to vector<8x128xf32>
    %5 = arith.addf %2, %4 : vector<8x128xf32>
    %6 = math.tanh %5 : vector<8x128xf32>
    %c0_5 = arith.constant 0 : index
    %c0_6 = arith.constant 0 : index
    %7 = vector.load %arg4[%c0_5, %c0_6] : memref<128x128xf32, #tpu.memory_space<vmem>>, vector<128x128xf32>
    %cst_7 = arith.constant dense<0.000000e+00> : vector<8x128xf32>
    %8 = tpu.matmul %6, %7, %cst_7 {dimension_numbers = #tpu.dot_dimension_numbers<[1], [1], [0], [0], [0, 0, 1, 0], [], []>} : vector<8x128xf32>, vector<128x128xf32>, vector<8x128xf32> -> vector<8x128xf32>
    %c0_8 = arith.constant 0 : index
    %c0_9 = arith.constant 0 : index
    %9 = vector.load %arg5[%c0_8, %c0_9] : memref<1x128xf32, #tpu.memory_space<vmem>>, vector<1x128xf32>
    %10 = vector.broadcast %9 : vector<1x128xf32> to vector<8x128xf32>
    %11 = arith.addf %8, %10 : vector<8x128xf32>
    %c0_10 = arith.constant 0 : index
    %c0_11 = arith.constant 0 : index
    %12 = vector.load %arg6[%c0_10, %c0_11] : memref<8x128xf32, #tpu.memory_space<vmem>>, vector<8x128xf32>
    tpu.vector_store %arg6[%c0_10, %c0_11], %11 {strides = array<i32>} : memref<8x128xf32, #tpu.memory_space<vmem>>, vector<8x128xf32>,
    return
  }
  func.func @transform_0(%arg0: i32) -> (i32, i32) {
    %c0_i32 = arith.constant 0 : i32
    %c0_i32_0 = arith.constant 0 : i32
    return %arg0, %c0_i32 : i32, i32
  }
  func.func @transform_1(%arg0: i32) -> (i32, i32) {
    %c0_i32 = arith.constant 0 : i32
    %c0_i32_0 = arith.constant 0 : i32
    %c0_i32_1 = arith.constant 0 : i32
    return %c0_i32, %c0_i32_0 : i32, i32
  }
  func.func @transform_2(%arg0: i32) -> (i32, i32) {
    %c0_i32 = arith.constant 0 : i32
    %c0_i32_0 = arith.constant 0 : i32
    %c0_i32_1 = arith.constant 0 : i32
    return %c0_i32, %c0_i32_0 : i32, i32
  }
  func.func @transform_3(%arg0: i32) -> (i32, i32) {
    %c0_i32 = arith.constant 0 : i32
    %c0_i32_0 = arith.constant 0 : i32
    %c0_i32_1 = arith.constant 0 : i32
    return %c0_i32, %c0_i32_0 : i32, i32
  }
  func.func @transform_4(%arg0: i32) -> (i32, i32) {
    %c0_i32 = arith.constant 0 : i32
    %c0_i32_0 = arith.constant 0 : i32
    %c0_i32_1 = arith.constant 0 : i32
    return %c0_i32, %c0_i32_0 : i32, i32
  }
  func.func @transform_5(%arg0: i32) -> (i32, i32) {
    %c0_i32 = arith.constant 0 : i32
    %c0_i32_0 = arith.constant 0 : i32
    return %arg0, %c0_i32 : i32, i32
  }
}

</mosaic_0001>

<bundles_post_ra>
// kernel: classification_head.1
= control target key start
LH: loop header
LB: loop body
LE: loop exit
PB: predicated region body
PF: predicated region fallthrough
CT: control target
= control target key end

     0   :  { %10 = vsyncpa [#allocation3], 0  ;;  %s725_s0 = inlined_call_operand.hbm [shape: f32[8,128], index: 0, kind: input, shape index: {}]   ;;  %s726_s1 = inlined_call_operand.hbm [shape: f32[128,128], index: 1, kind: input, shape index: {}]   ;;  %s727_s2 = inlined_call_operand.hbm [shape: f32[1,128], index: 2, kind: input, shape index: {}]   ;;  %s728_s3 = inlined_call_operand.hbm [shape: f32[128,128], index: 3, kind: input, shape index: {}]   ;;  %s729_s4 = inlined_call_operand.hbm [shape: f32[1,128], index: 4, kind: input, shape index: {}]   ;;  %s730_s5 = inlined_call_operand.hbm [shape: f32[8,128], index: 5, kind: output, shape index: {}]  }
   0x1   :  { %11 = vsyncpa [#allocation6], 0 }
   0x2   :  { %12 = vsyncpa [#allocation9], 0 }
   0x3   :  { %13 = vsyncpa [#allocation4], 0  ;;  %s596_s18 = smov [#allocation5]   ;;  %s456_s22 = scalar_lea.hbm %s726_s1, 2048 }
   0x4   :  { %s29_s19 = sshll.u32 %s596_s18, 4  ;;  %p457_p0 = scmp.ne.s32.totalorder %s726_s1, %s456_s22  ;;  %s30_s19 = int_to_ptr.vmem [resolvable:$true] %s29_s19 }
   0x5   :  { %p460_p1 = scmp.lt.u32.totalorder %s456_s22, %s726_s1 }
   0x7   :  { %p462_p2 = pnand %p460_p1, %p457_p0 }
   0x9   :  { %465 = shalt.err (!%p462_p2)
}
   0xa   :  { %s466_s27 = scalar_lea.vmem %s30_s19, 2048  ;;  %p471_p4 = scmp.lt.s32.totalorder %s30_s19, %s30_s19 }
   0xb   :  { %p467_p3 = scmp.ne.s32.totalorder %s30_s19, %s466_s27  ;;  %p472_p5 = scmp.lt.s32.totalorder %s466_s27, %s466_s27 }
   0xd   :  { %p473_p6 = por %p472_p5, %p471_p4 }
   0xf   :  { %p474_p7 = pnand %p473_p6, %p467_p3 }
  0x11   :  { %477 = shalt.err (!%p474_p7)
}
  0x12   :  { %s597_s28 = smov 128   ;;  %s598_s29 = smov 8  }
  0x13   :  { %35 = dma.hbm_to_vmem [thread:$0]  %s726_s1, 2048, %s30_s19, [#allocation6], %s597_s28, %s597_s28, %s598_s29  }
  0x14   :  { %s599_s7 = smov [#allocation8]   ;;  %s600_s9 = smov [#allocation2]  }
  0x15   :  { %s51_s8 = sshll.u32 %s599_s7, 4  ;;  %s20_s10 = sshll.u32 %s600_s9, 4  ;;  %s52_s8 = int_to_ptr.vmem [resolvable:$true] %s51_s8  ;;  %s21_s10 = int_to_ptr.vmem [resolvable:$true] %s20_s10 }
  0x16   :  { %s478_s13 = scalar_lea.hbm %s728_s3, 2048 }
  0x17   :  { %p479_p8 = scmp.ne.s32.totalorder %s728_s3, %s478_s13  ;;  %p482_p9 = scmp.lt.u32.totalorder %s478_s13, %s728_s3 }
  0x19   :  { %p484_p10 = pnand %p482_p9, %p479_p8 }
  0x1b   :  { %487 = shalt.err (!%p484_p10)
}
  0x1c   :  { %s488_s1 = scalar_lea.vmem %s52_s8, 2048  ;;  %p493_p12 = scmp.lt.s32.totalorder %s52_s8, %s52_s8 }
  0x1d   :  { %p489_p11 = scmp.ne.s32.totalorder %s52_s8, %s488_s1  ;;  %p494_p13 = scmp.lt.s32.totalorder %s488_s1, %s488_s1 }
  0x1f   :  { %p495_p0 = por %p494_p13, %p493_p12 }
  0x21   :  { %p496_p1 = pnand %p495_p0, %p489_p11 }
  0x23   :  { %499 = shalt.err (!%p496_p1)
}
  0x24   :  { %57 = dma.hbm_to_vmem [thread:$0]  %s728_s3, 2048, %s52_s8, [#allocation9], %s597_s28, %s597_s28, %s598_s29  }
  0x25   :  { %s500_s22 = scalar_lea.hbm %s725_s0, 128 }
  0x26   :  { %p501_p2 = scmp.ne.s32.totalorder %s725_s0, %s500_s22  ;;  %p504_p3 = scmp.lt.u32.totalorder %s500_s22, %s725_s0 }
  0x28   :  { %p506_p4 = pnand %p504_p3, %p501_p2 }
  0x2a   :  { %509 = shalt.err (!%p506_p4)
}
  0x2b   :  { %s510_s27 = scalar_lea.vmem %s21_s10, 128  ;;  %p515_p6 = scmp.lt.s32.totalorder %s21_s10, %s21_s10 }
  0x2c   :  { %p511_p5 = scmp.ne.s32.totalorder %s21_s10, %s510_s27  ;;  %p516_p7 = scmp.lt.s32.totalorder %s510_s27, %s510_s27 }
  0x2e   :  { %p517_p8 = por %p516_p7, %p515_p6 }
  0x30   :  { %p518_p9 = pnand %p517_p8, %p511_p5 }
  0x32   :  { %521 = shalt.err (!%p518_p9)
}
  0x33   :  { %23 = dma.hbm_to_vmem [thread:$0]  %s725_s0, 128, %s21_s10, [#allocation3]  }
  0x34   :  { %s601_s29 = smov [#allocation7]   ;;  %s602_s6 = smov [#allocation10]  }
  0x35   :  { %s42_s30 = sshll.u32 %s601_s29, 4  ;;  %s64_s7 = sshll.u32 %s602_s6, 4  ;;  %s43_s30 = int_to_ptr.vmem [resolvable:$true] %s42_s30  ;;  %s65_s7 = int_to_ptr.vmem [resolvable:$true] %s64_s7 }
  0x36   :  { %s522_s11 = scalar_lea.hbm %s727_s2, 16 }
  0x37   :  { %p523_p10 = scmp.ne.s32.totalorder %s727_s2, %s522_s11  ;;  %p526_p11 = scmp.lt.u32.totalorder %s522_s11, %s727_s2 }
  0x39   :  { %p528_p12 = pnand %p526_p11, %p523_p10 }
  0x3b   :  { %531 = shalt.err (!%p528_p12)
}
  0x3c   :  { %s532_s0 = scalar_lea.vmem %s43_s30, 16  ;;  %s536_s10 = scalar_lea.vmem %s43_s30, 32 }
  0x3d   :  { %p533_p13 = scmp.ne.s32.totalorder %s43_s30, %s532_s0  ;;  %p537_p0 = scmp.lt.s32.totalorder %s43_s30, %s43_s30 }
  0x3e   :  { %p538_p1 = scmp.lt.s32.totalorder %s536_s10, %s532_s0 }
  0x40   :  { %p539_p2 = por %p538_p1, %p537_p0 }
  0x42   :  { %p540_p3 = pnand %p539_p2, %p533_p13 }
  0x44   :  { %543 = shalt.err (!%p540_p3)
}
  0x45   :  { %45 = dma.hbm_to_vmem [thread:$0]  %s727_s2, 16, %s43_s30, [#allocation6]  }
  0x46   :  { %s544_s19 = scalar_lea.hbm %s729_s4, 16 }
  0x47   :  { %p545_p4 = scmp.ne.s32.totalorder %s729_s4, %s544_s19  ;;  %p548_p5 = scmp.lt.u32.totalorder %s544_s19, %s729_s4 }
  0x49   :  { %p550_p6 = pnand %p548_p5, %p545_p4 }
  0x4b   :  { %553 = shalt.err (!%p550_p6)
}
  0x4c   :  { %s554_s24 = scalar_lea.vmem %s65_s7, 16  ;;  %s558_s25 = scalar_lea.vmem %s65_s7, 32 }
  0x4d   :  { %p555_p7 = scmp.ne.s32.totalorder %s65_s7, %s554_s24  ;;  %p559_p8 = scmp.lt.s32.totalorder %s65_s7, %s65_s7 }
  0x4e   :  { %p560_p9 = scmp.lt.s32.totalorder %s558_s25, %s554_s24 }
  0x50   :  { %p561_p10 = por %p560_p9, %p559_p8 }
  0x52   :  { %p562_p11 = pnand %p561_p10, %p555_p7 }
  0x54   :  { %565 = shalt.err (!%p562_p11)
}
  0x55   :  { %67 = dma.hbm_to_vmem [thread:$0]  %s729_s4, 16, %s65_s7, [#allocation9]  }
  0x56   :  { %588 = dma.done.wait [#allocation3], 128  }
  0x57   :  { %589 = vsyncadd [#allocation3], 4294967168 }
  0x58   :  { %590 = dma.done.wait [#allocation6], 2064  }
  0x59   :  { %591 = vsyncadd [#allocation6], 4294965232 }
  0x5a   :  { %592 = dma.done.wait [#allocation9], 2064  }
  0x5b   :  { %593 = vsyncadd [#allocation9], 4294965232  ;;  %v603_v0 = vmov 0.0|0.0   ;;  %vm604_vm0 = vmmov 0   ;;  %v605_v1 = vmov 0.0   ;;  %v84_v2 = vld [vmem:[#allocation5] sm:$0xff] }
  0x5c   :  { %395 = vmatprep.subr.bf16.mxu0 %v603_v0  ;;  %357 = vmatprep.mubr.msk.f32.mxu0 %vm604_vm0, %v605_v1  ;;  %v85_v3 = vld [vmem:[#allocation5 + $0x8] sm:$0xff]  ;;  %v86_v5 = vld [vmem:[#allocation5 + $0x10] sm:$0xff]  ;;  %v87_v6 = vld [vmem:[#allocation5 + $0x18] sm:$0xff]  ;;  %s606_s4 = smov [#allocation11]  }
  0x5d   :  { %419 = vmatprep.subr.bf16.mxu1 %v603_v0  ;;  %392 = vmatprep.mubr.msk.f32.mxu1 %vm604_vm0, %v605_v1  ;;  %v396_v4 = vpack.c.bf16 %v85_v3, %v84_v2  ;;  %v178_v7 = vld [vmem:[#allocation8] sm:$0xff]  ;;  %v179_v8 = vld [vmem:[#allocation8 + $0x8] sm:$0xff]  ;;  %v399_v9 = vpack.c.bf16 %v87_v6, %v86_v5  ;;  %v180_v11 = vld [vmem:[#allocation8 + $0x10] sm:$0xff]  ;;  %s278_s27 = sshll.u32 %s606_s4, 4  ;;  %s279_s27 = int_to_ptr.vmem [resolvable:$true] %s278_s27 }
  0x5e   :  { %v420_v10 = vpack.c.bf16 %v179_v8, %v178_v7  ;;  %v181_v12 = vld [vmem:[#allocation8 + $0x18] sm:$0xff]  ;;  %v89_v14 = vld [vmem:[#allocation5 + $0x28] sm:$0xff]  ;;  %v90_v19 = vld [vmem:[#allocation5 + $0x30] sm:$0xff]  ;;  %s566_s3 = scalar_lea.vmem %s279_s27, 128  ;;  %p571_p13 = scmp.lt.s32.totalorder %s279_s27, %s279_s27 }
  0x5f   :  { %397 = vmatpush3.bf16.xpose.msra.mxu0 %v396_v4  ;;  %v88_v13 = vld [vmem:[#allocation5 + $0x20] sm:$0xff]  ;;  %v423_v15 = vpack.c.bf16 %v181_v12, %v180_v11  ;;  %v183_v18 = vld [vmem:[#allocation8 + $0x28] sm:$0xff]  ;;  %v91_v20 = vld [vmem:[#allocation5 + $0x38] sm:$0xff]  ;;  %p567_p12 = scmp.ne.s32.totalorder %s279_s27, %s566_s3  ;;  %p572_p0 = scmp.lt.s32.totalorder %s566_s3, %s566_s3 }
  0x60   :  { %398 = vmatprep.subr.bf16.mxu0 %v603_v0  ;;  %421 = vmatpush3.bf16.xpose.msra.mxu1 %v420_v10  ;;  %v402_v16 = vpack.c.bf16 %v89_v14, %v88_v13  ;;  %v182_v17 = vld [vmem:[#allocation8 + $0x20] sm:$0xff]  ;;  %v405_v22 = vpack.c.bf16 %v91_v20, %v90_v19  ;;  %v184_v23 = vld [vmem:[#allocation8 + $0x30] sm:$0xff]  ;;  %v185_v24 = vld [vmem:[#allocation8 + $0x38] sm:$0xff] }
  0x61   :  { %422 = vmatprep.subr.bf16.mxu1 %v603_v0  ;;  %v426_v21 = vpack.c.bf16 %v183_v18, %v182_v17  ;;  %v92_v25 = vld [vmem:[#allocation5 + $0x40] sm:$0xff]  ;;  %v93_v26 = vld [vmem:[#allocation5 + $0x48] sm:$0xff]  ;;  %v429_v27 = vpack.c.bf16 %v185_v24, %v184_v23  ;;  %v94_v31 = vld [vmem:[#allocation5 + $0x50] sm:$0xff]  ;;  %p573_p1 = por %p572_p0, %p571_p13 }
  0x62   :  { %v408_v28 = vpack.c.bf16 %v93_v26, %v92_v25  ;;  %v186_v29 = vld [vmem:[#allocation8 + $0x40] sm:$0xff]  ;;  %v187_v30 = vld [vmem:[#allocation8 + $0x48] sm:$0xff]  ;;  %v95_v32 = vld [vmem:[#allocation5 + $0x58] sm:$0xff] }
  0x63   :  { %v432_v33 = vpack.c.bf16 %v187_v30, %v186_v29  ;;  %v411_v34 = vpack.c.bf16 %v95_v32, %v94_v31  ;;  %v188_v35 = vld [vmem:[#allocation8 + $0x50] sm:$0xff]  ;;  %v189_v36 = vld [vmem:[#allocation8 + $0x58] sm:$0xff]  ;;  %v97_v38 = vld [vmem:[#allocation5 + $0x68] sm:$0xff]  ;;  %p574_p2 = pnand %p573_p1, %p567_p12 }
  0x64   :  { %v96_v37 = vld [vmem:[#allocation5 + $0x60] sm:$0xff]  ;;  %v435_v39 = vpack.c.bf16 %v189_v36, %v188_v35  ;;  %v191_v42 = vld [vmem:[#allocation8 + $0x68] sm:$0xff]  ;;  %v99_v44 = vld [vmem:[#allocation5 + $0x78] sm:$0xff] }
  0x65   :  { %v414_v40 = vpack.c.bf16 %v97_v38, %v96_v37  ;;  %v190_v41 = vld [vmem:[#allocation8 + $0x60] sm:$0xff]  ;;  %v98_v43 = vld [vmem:[#allocation5 + $0x70] sm:$0xff]  ;;  %v83_v47 = vld [vmem:[#allocation2] sm:$0xff] }
  0x66   :  { %v438_v45 = vpack.c.bf16 %v191_v42, %v190_v41  ;;  %v417_v46 = vpack.c.bf16 %v99_v44, %v98_v43  ;;  %v192_v48 = vld [vmem:[#allocation8 + $0x70] sm:$0xff]  ;;  %v193_v49 = vld [vmem:[#allocation8 + $0x78] sm:$0xff]  ;;  %v290_v56 = vld [vmem:[#allocation10] ss:$0 sm:$0xff] }
  0x67   :  { %400 = vmatpush3.bf16.xpose.msra.mxu0 %v399_v9  ;;  %v441_v50 = vpack.c.bf16 %v193_v49, %v192_v48  ;;  %v289_v51 = vld [vmem:[#allocation7] ss:$0 sm:$0xff] }
  0x68   :  { %401 = vmatprep.subr.bf16.mxu0 %v603_v0  ;;  %424 = vmatpush3.bf16.xpose.msra.mxu1 %v423_v15 }
  0x69   :  { %425 = vmatprep.subr.bf16.mxu1 %v603_v0 }
  0x6f   :  { %403 = vmatpush3.bf16.xpose.msra.mxu0 %v402_v16 }
  0x70   :  { %404 = vmatprep.subr.bf16.mxu0 %v603_v0  ;;  %427 = vmatpush3.bf16.xpose.msra.mxu1 %v426_v21 }
  0x71   :  { %428 = vmatprep.subr.bf16.mxu1 %v603_v0 }
  0x77   :  { %406 = vmatpush3.bf16.xpose.msra.mxu0 %v405_v22 }
  0x78   :  { %407 = vmatprep.subr.bf16.mxu0 %v603_v0  ;;  %430 = vmatpush3.bf16.xpose.msra.mxu1 %v429_v27 }
  0x79   :  { %431 = vmatprep.subr.bf16.mxu1 %v603_v0 }
  0x7f   :  { %409 = vmatpush3.bf16.xpose.msra.mxu0 %v408_v28 }
  0x80   :  { %410 = vmatprep.subr.bf16.mxu0 %v603_v0  ;;  %433 = vmatpush3.bf16.xpose.msra.mxu1 %v432_v33 }
  0x81   :  { %434 = vmatprep.subr.bf16.mxu1 %v603_v0 }
  0x87   :  { %412 = vmatpush3.bf16.xpose.msra.mxu0 %v411_v34 }
  0x88   :  { %413 = vmatprep.subr.bf16.mxu0 %v603_v0  ;;  %436 = vmatpush3.bf16.xpose.msra.mxu1 %v435_v39 }
  0x89   :  { %437 = vmatprep.subr.bf16.mxu1 %v603_v0 }
  0x8f   :  { %415 = vmatpush3.bf16.xpose.msra.mxu0 %v414_v40 }
  0x90   :  { %416 = vmatprep.subr.bf16.mxu0 %v603_v0  ;;  %439 = vmatpush3.bf16.xpose.msra.mxu1 %v438_v45 }
  0x91   :  { %440 = vmatprep.subr.bf16.mxu1 %v603_v0 }
  0x97   :  { %418 = vmatpush3.bf16.xpose.msra.mxu0 %v417_v46 }
  0x98   :  { %442 = vmatpush3.bf16.xpose.msra.mxu1 %v441_v50 }
  0x9e   :  { %358 = vmatmul.mubr.f32.vlgmr.msra.gmra.mrb[0].mxu0 %v83_v47 }
 0x171   :  { %v173_v52 = vpop.f32.mrb[0].mxu0 }
 0x172   :  { %v174_v53 = vadd.f32 %v289_v51, %v173_v52  ;;  %v359_v54 = vpop.f32.mrb[1].mxu0 }
 0x174   :  { %454 = vtanh.f32 %v174_v53 }
 0x17e   :  { %v455_v55 = vpop.eup %454 }
 0x17f   :  { %393 = vmatmul.mubr.f32.vlgmr.msra.gmra.mrb[0].mxu1 %v455_v55 }
 0x252   :  { %v267_v57 = vpop.f32.mrb[0].mxu1 }
 0x253   :  { %v268_v58 = vadd.f32 %v290_v56, %v267_v57  ;;  %v394_v59 = vpop.f32.mrb[1].mxu1 }
 0x255   :  { %271 = vst [vmem:[#allocation11] sm:$0xff] %v268_v58 }
 0x256   :  { %577 = shalt.err (!%p574_p2)
}
 0x257   :  { %s578_s30 = scalar_lea.hbm %s730_s5, 128 }
 0x258   :  { %p579_p3 = scmp.ne.s32.totalorder %s730_s5, %s578_s30  ;;  %p582_p4 = scmp.lt.u32.totalorder %s578_s30, %s730_s5 }
 0x25a   :  { %p584_p5 = pnand %p582_p4, %p579_p3 }
 0x25c   :  { %587 = shalt.err (!%p584_p5)
}
 0x25d   :  { %281 = dma.vmem_to_hbm [thread:$0]  %s279_s27, 128, %s730_s5, [#allocation4]  }
 0x25e   :  { %594 = dma.done.wait [#allocation4], 128  }
 0x25f   :  { %595 = vsyncadd [#allocation4], 4294967168 }
 0x260   :  { %285 = vsyncpa [#allocation3], 1 }
 0x261   :  { %286 = vsyncpa [#allocation6], 1 }
 0x262   :  { %287 = vsyncpa [#allocation9], 1 }
 0x263   :  { %288 = vsyncpa [#allocation4], 1 }

</bundles_post_ra>
